<compile_context>
chip_gen: v7x
topology: tpu7x:2x2x1
jax: 0.10.0
libtpu: 0.0.40
codegen_flags: <defaults>
</compile_context>

<pallas_src>
import functools

import jax
import jax.numpy as jnp
from jax.experimental import pallas as pl
from jax.experimental.pallas import tpu as pltpu

BN_EPS = 1e-5
LANE = 128               # pad all feature axes to full vreg lanes
SUBLANE = 16             # fused path: pad batch to 16 (covers f32/bf16 tiling)
DEFAULT_TILE_ROWS = 256  # tiled path: >=256 rows per MXU call (v6e/v7x MXU)


def _round_up(v, m):
    return ((v + m - 1) // m) * m


def _pad2d(a, rows, cols, value=0.0):
    pr, pc = rows - a.shape[0], cols - a.shape[1]
    if pr == 0 and pc == 0:
        return a
    return jnp.pad(a, ((0, pr), (0, pc)), constant_values=value)


def _full_spec(shape):
    # Whole-array VMEM block (gridless call).
    return pl.BlockSpec(shape, lambda: (0,) * len(shape))


def _vmem_budget_bytes():
    """~70% of physical VMEM; conservative 64 MiB (v7x per-TC) fallback."""
    cap = 64 * 2**20
    try:
        info = pltpu.get_tpu_info()
        cap = int(getattr(info, "vmem_capacity_bytes", cap)) or cap
    except Exception:
        pass
    return int(cap * 0.7)


# --------------------------- parameter preparation ---------------------------

def init_mlp_params(key, num_layers, input_dim, hidden_dim, output_dim):
    """Deterministic synthetic init mirroring the PyTorch module's shapes."""
    if num_layers < 1:
        raise ValueError("number of layers should be positive!")
    params = {"linears": [], "bn": []}
    dims = (
        [(input_dim, output_dim)]
        if num_layers == 1
        else [(input_dim, hidden_dim)]
        + [(hidden_dim, hidden_dim)] * (num_layers - 2)
        + [(hidden_dim, output_dim)]
    )
    for din, dout in dims:
        key, kw, kb = jax.random.split(key, 3)
        bound = 1.0 / jnp.sqrt(din)
        # stored pre-transposed: (din, dout) so kernels compute x @ W (+ b)
        w = jax.random.uniform(kw, (din, dout), jnp.float32, -bound, bound)
        b = jax.random.uniform(kb, (1, dout), jnp.float32, -bound, bound)
        params["linears"].append((w, b))
    for _ in range(max(num_layers - 1, 0)):
        # BatchNorm1d default init: weight=1, bias=0
        params["bn"].append(
            (jnp.ones((1, hidden_dim), jnp.float32),
             jnp.zeros((1, hidden_dim), jnp.float32))
        )
    return params


def prepare_mlp_params(params, num_layers):
    """Pad + cast parameters ONCE (call this outside the forward).

    * Weights -> bf16, zero-padded to lane-dense (multiple-of-128) shapes.
    * Hidden-layer linear biases are dropped (train-mode BN cancels them).
    * gamma/beta of all BN layers packed into one (num_hidden, 2, H_p) f32
      array: one DMA descriptor instead of two tiny inputs per layer.
    """
    num_hidden = num_layers - 1
    prepared = {}
    ws = []
    prev_p = _round_up(params["linears"][0][0].shape[0], LANE)
    for i in range(num_hidden):
        w, _b = params["linears"][i]
        dh_p = _round_up(w.shape[1], LANE)
        ws.append(_pad2d(w, prev_p, dh_p).astype(jnp.bfloat16))
        prev_p = dh_p
    prepared["ws"] = tuple(ws)
    if num_hidden > 0:
        hp = ws[0].shape[1]
        gb = []
        for gamma, beta in params["bn"][:num_hidden]:
            gb.append(jnp.stack([_pad2d(gamma, 1, hp, value=1.0)[0],
                                 _pad2d(beta, 1, hp, value=0.0)[0]], axis=0))
        prepared["gb"] = jnp.stack(gb, axis=0)            # (num_hidden, 2, H_p)
    w, b = params["linears"][-1]
    dout_p = _round_up(w.shape[1], LANE)
    prepared["w_out"] = _pad2d(w, prev_p, dout_p).astype(jnp.bfloat16)
    prepared["b_out"] = _pad2d(b, 1, dout_p)              # f32, kept (no BN after)
    return prepared


# ------------------------------- fused path ----------------------------------

def _make_fused_mlp_kernel(num_hidden, n_valid):
    """Whole MLP in one invocation; activations never leave VMEM/vregs."""
    inv_n = 1.0 / float(n_valid)

    def kernel(*refs):
        # refs = (x, w_0..w_{nh-1}, [gb], w_out, b_out, o)
        x_ref, o_ref = refs[0], refs[-1]
        h = x_ref[...]                                     # bf16 (Np, Din_p)

        if num_hidden > 0:
            gb_all = refs[1 + num_hidden][...]             # (nh, 2, H_p) f32
            rows = jax.lax.broadcasted_iota(jnp.int32, (h.shape[0], 1), 0)
            valid = rows < n_valid                         # (Np, 1) bool

        for i in range(num_hidden):
            w_ref = refs[1 + i]
            gamma = gb_all[i, 0:1, :]
            beta = gb_all[i, 1:2, :]
            # No bias: BN's mean subtraction cancels a per-column constant,
            # and zero padded rows of h (no bias) keep padded rows of z at
            # exactly zero, so the batch sums below need no masking.
            z = jnp.dot(h, w_ref[...], preferred_element_type=jnp.float32)
            mean = jnp.sum(z, axis=0, keepdims=True) * inv_n
            d = z - mean
            dv = jnp.where(valid, d, 0.0)                  # mask padded rows only here
            var = jnp.maximum(jnp.sum(dv * d, axis=0, keepdims=True) * inv_n, 0.0)
            scale = jax.lax.rsqrt(var + BN_EPS) * gamma
            shift = beta - mean * scale
            h = jnp.maximum(z * scale + shift, 0.0)
            # Zero padded rows so the next layer's z padded rows stay zero.
            h = jnp.where(valid, h, 0.0).astype(jnp.bfloat16)

        w_ref, b_ref = refs[-3], refs[-2]
        o_ref[...] = jnp.dot(h, w_ref[...],
                             preferred_element_type=jnp.float32) + b_ref[...]

    return kernel


def _mlp_forward_fused(inputs, num_hidden, n_valid, dout_p, footprint, budget):
    x_p = inputs[0]
    n_p = x_p.shape[0]
    weights = list(inputs[1:1 + num_hidden]) + [inputs[-2]]
    flops = sum(2 * n_p * w.shape[0] * w.shape[1] for w in weights)
    in_bytes = sum(a.size * a.dtype.itemsize for a in inputs)
    out_bytes = n_p * dout_p * 4
    hp = weights[0].shape[1] if num_hidden > 0 else dout_p
    vmem_limit = int(min(max(footprint * 5 // 4, 16 * 2**20), budget))

    # TODO(synk): optionally emit bf16 output (halves output HBM bytes) when
    # the caller tolerates it; f32 kept to match the PyTorch module exactly.
    return pl.pallas_call(
        _make_fused_mlp_kernel(num_hidden, n_valid),
        out_shape=jax.ShapeDtypeStruct((n_p, dout_p), jnp.float32),
        in_specs=[_full_spec(a.shape) for a in inputs],
        out_specs=_full_spec((n_p, dout_p)),
        compiler_params=pltpu.CompilerParams(vmem_limit_bytes=vmem_limit),
        cost_estimate=pl.CostEstimate(
            flops=flops,
            transcendentals=num_hidden * hp,     # one rsqrt per BN feature
            bytes_accessed=in_bytes + out_bytes),
    )(*inputs)


# ------------------------------- tiled path ----------------------------------

def _make_bn_relu_hidden_kernel(n_valid, tile_rows):
    """grid = (2, n_tiles): pass 0 accumulates batch sum / sumsq of z = h @ W,
    pass 1 recomputes z and applies train-mode BN + ReLU with the full-batch
    statistics.  W / gamma / beta stay VMEM-resident across the whole grid.
    Recomputing z trades one extra MXU pass for not round-tripping the
    (N, H) f32 pre-activation through HBM."""
    inv_n = 1.0 / float(n_valid)

    def kernel(x_ref, w_ref, gb_ref, o_ref, sum_ref, sq_ref, scale_ref, shift_ref):
        p = pl.program_id(0)
        t = pl.program_id(1)
        nt = pl.num_programs(1)

        z = jnp.dot(x_ref[...], w_ref[...], preferred_element_type=jnp.float32)

        @pl.when((p == 0) & (t == 0))
        def _():
            sum_ref[...] = jnp.zeros_like(sum_ref)
            sq_ref[...] = jnp.zeros_like(sq_ref)

        @pl.when(p == 0)
        def _():
            # Padded batch rows of x are zero and there is no bias, so their
            # z rows are exactly zero and drop out of the sums.
            sum_ref[...] += jnp.sum(z, axis=0, keepdims=True)
            sq_ref[...] += jnp.sum(z * z, axis=0, keepdims=True)

        @pl.when((p == 0) & (t == nt - 1))
        def _():
            gb = gb_ref[...]                               # (2, H_p) f32
            mean = sum_ref[...] * inv_n
            var = jnp.maximum(sq_ref[...] * inv_n - mean * mean, 0.0)
            scale = jax.lax.rsqrt(var + BN_EPS) * gb[0:1, :]
            scale_ref[...] = scale
            shift_ref[...] = gb[1:2, :] - mean * scale

        @pl.when(p == 1)
        def _():
            h = jnp.maximum(z * scale_ref[...] + shift_ref[...], 0.0)
            rows = (jax.lax.broadcasted_iota(jnp.int32, (z.shape[0], 1), 0)
                    + t * tile_rows)
            # Zero padded rows so padding stays inert for the next layer.
            o_ref[...] = jnp.where(rows < n_valid, h, 0.0).astype(o_ref.dtype)

    return kernel


def _linear_tiled_kernel(h_ref, w_ref, b_ref, o_ref):
    o_ref[...] = (jnp.dot(h_ref[...], w_ref[...],
                          preferred_element_type=jnp.float32) + b_ref[...])


def _mlp_forward_tiled(x, prepared, num_hidden, n_valid, din_p, dout_p,
                       tile_rows, budget):
    n_p = _round_up(max(x.shape[0], tile_rows), tile_rows)
    n_tiles = n_p // tile_rows
    h = _pad2d(x, n_p, din_p).astype(jnp.bfloat16)

    for i in range(num_hidden):
        w = prepared["ws"][i]                              # (prev_p, H_p) bf16
        gb = prepared["gb"][i]                             # (2, H_p) f32
        prev_p, hp = w.shape
        est = (2 * tile_rows * prev_p * 2                  # x tile, double-buffered
               + w.size * w.dtype.itemsize                 # resident weight
               + gb.size * gb.dtype.itemsize
               + 2 * tile_rows * hp * 2                    # out tile, double-buffered
               + 3 * tile_rows * hp * 4                    # f32 temporaries
               + 4 * hp * 4)                               # scratch vectors
        vmem_limit = int(min(max(est * 3 // 2, 8 * 2**20), budget))
        h = pl.pallas_call(
            _make_bn_relu_hidden_kernel(n_valid, tile_rows),
            out_shape=jax.ShapeDtypeStruct((n_p, hp), jnp.bfloat16),
            grid_spec=pltpu.PrefetchScalarGridSpec(
                num_scalar_prefetch=0,
                grid=(2, n_tiles),
                in_specs=[
                    pl.BlockSpec((tile_rows, prev_p), lambda p, t: (t, 0)),
                    pl.BlockSpec((prev_p, hp), lambda p, t: (0, 0)),   # resident
                    pl.BlockSpec((2, hp), lambda p, t: (0, 0)),        # resident
                ],
                # During the stats pass (p == 0) the output block index is
                # pinned at 0, so no partial tiles are written back to HBM.
                out_specs=pl.BlockSpec((tile_rows, hp), lambda p, t: (t * p, 0)),
                scratch_shapes=[pltpu.VMEM((1, hp), jnp.float32)] * 4,
            ),
            compiler_params=pltpu.CompilerParams(
                dimension_semantics=("arbitrary", "arbitrary"),
                vmem_limit_bytes=vmem_limit),
        )(h, w, gb)

    w, b = prepared["w_out"], prepared["b_out"]
    prev_p = w.shape[0]
    est = (2 * tile_rows * prev_p * 2 + w.size * w.dtype.itemsize
           + b.size * b.dtype.itemsize + 2 * tile_rows * dout_p * 4)
    vmem_limit = int(min(max(est * 3 // 2, 8 * 2**20), budget))
    out = pl.pallas_call(
        _linear_tiled_kernel,
        out_shape=jax.ShapeDtypeStruct((n_p, dout_p), jnp.float32),
        grid_spec=pltpu.PrefetchScalarGridSpec(
            num_scalar_prefetch=0,
            grid=(n_tiles,),
            in_specs=[
                pl.BlockSpec((tile_rows, prev_p), lambda t: (t, 0)),
                pl.BlockSpec((prev_p, dout_p), lambda t: (0, 0)),
                pl.BlockSpec((1, dout_p), lambda t: (0, 0)),
            ],
            out_specs=pl.BlockSpec((tile_rows, dout_p), lambda t: (t, 0)),
        ),
        compiler_params=pltpu.CompilerParams(
            dimension_semantics=("parallel",),
            vmem_limit_bytes=vmem_limit),
    )(h, w, b)
    return out


# ------------------------------- dispatcher ----------------------------------

@functools.partial(
    jax.jit, static_argnames=("num_layers", "out_dim", "force_tiled", "tile_rows"))
def mlp_forward(x, prepared, *, num_layers, out_dim,
                force_tiled=False, tile_rows=DEFAULT_TILE_ROWS):
    if num_layers < 1:
        raise ValueError("number of layers should be positive!")
    n = x.shape[0]
    num_hidden = num_layers - 1
    din_p = (prepared["ws"][0].shape[0] if num_hidden > 0
             else prepared["w_out"].shape[0])
    dout_p = prepared["w_out"].shape[1]
    budget = _vmem_budget_bytes()

    # Explicit fused-path footprint: padded operands + output + ~4 activation-
    # sized f32 temporaries; +25% headroom is applied against the budget.
    n_p = _round_up(max(n, SUBLANE), SUBLANE)
    param_inputs = (list(prepared["ws"])
                    + ([prepared["gb"]] if num_hidden > 0 else [])
                    + [prepared["w_out"], prepared["b_out"]])
    in_bytes = n_p * din_p * 2 + sum(a.size * a.dtype.itemsize
                                     for a in param_inputs)
    max_feat = max([din_p] + [a.shape[-1] for a in param_inputs])
    footprint = in_bytes + n_p * dout_p * 4 + 4 * n_p * max_feat * 4

    if (not force_tiled) and footprint * 5 // 4 <= budget:
        x_p = _pad2d(x, n_p, din_p).astype(jnp.bfloat16)
        inputs = [x_p] + param_inputs
        out_p = _mlp_forward_fused(inputs, num_hidden, n, dout_p,
                                   footprint, budget)
        return out_p[:n, :out_dim]

    out_p = _mlp_forward_tiled(x, prepared, num_hidden, n, din_p, dout_p,
                               tile_rows, budget)
    return out_p[:n, :out_dim]


# ------------------------------- references ----------------------------------

def _reference_forward_f32(x, params, num_layers):
    """Pure-JAX f32 reference (exact PyTorch train-mode semantics, with bias)."""
    if num_layers == 1:
        w, b = params["linears"][0]
        return x @ w + b
    h = x
    for i in range(num_layers - 1):
        w, b = params["linears"][i]
        gamma, beta = params["bn"][i]
        z = h @ w + b
        mean = z.mean(axis=0, keepdims=True)
        var = ((z - mean) ** 2).mean(axis=0, keepdims=True)
        h = jnp.maximum((z - mean) / jnp.sqrt(var + BN_EPS) * gamma + beta, 0.0)
    w, b = params["linears"][-1]
    return h @ w + b


def _reference_forward_matched(x, params, num_layers):
    """Mirrors the kernels' numeric policy (bf16 matmul operands, f32 accum,
    hidden bias canceled by BN, centered variance)."""
    h = x.astype(jnp.bfloat16)
    for i in range(num_layers - 1):
        w, _b = params["linears"][i]
        gamma, beta = params["bn"][i]
        z = jnp.dot(h, w.astype(jnp.bfloat16),
                    preferred_element_type=jnp.float32)
        mean = z.mean(axis=0, keepdims=True)
        var = jnp.maximum(((z - mean) ** 2).mean(axis=0, keepdims=True), 0.0)
        scale = jax.lax.rsqrt(var + BN_EPS) * gamma
        h = jnp.maximum(z * scale + (beta - mean * scale), 0.0).astype(jnp.bfloat16)
    w, b = params["linears"][-1]
    return jnp.dot(h, w.astype(jnp.bfloat16),
                   preferred_element_type=jnp.float32) + b


if __name__ == "__main__":
    num_layers = 3
    batch, input_dim, hidden_dim, output_dim = 8, 16, 32, 8

    key = jax.random.PRNGKey(0)
    key, kx = jax.random.split(key)
    x = jax.random.normal(kx, (batch, input_dim), jnp.float32)
    params = init_mlp_params(key, num_layers, input_dim, hidden_dim, output_dim)
    prepared = prepare_mlp_params(params, num_layers)   # pad/cast ONCE

    # --- fused path (whole MLP in one pallas_call) ---------------------------
    out = mlp_forward(x, prepared, num_layers=num_layers, out_dim=output_dim)
    jax.block_until_ready(out)
    assert out.shape == (batch, output_dim)

    ref_matched = _reference_forward_matched(x, params, num_layers)
    assert jnp.allclose(out, ref_matched, atol=2e-2, rtol=2e-2), \
        "fused path mismatch vs matched (bf16-matmul) reference"
    ref_f32 = _reference_forward_f32(x, params, num_layers)
    assert jnp.allclose(out, ref_f32, atol=1e-1, rtol=5e-2), \
        "fused path mismatch vs f32 reference"

    # --- batch-tiled path (weights VMEM-resident, two-sweep BN) --------------
    key, kx2 = jax.random.split(key)
    x_big = jax.random.normal(kx2, (600, input_dim), jnp.float32)
    out_t = mlp_forward(x_big, prepared, num_layers=num_layers,
                        out_dim=output_dim, force_tiled=True, tile_rows=256)
    jax.block_until_ready(out_t)
    assert out_t.shape == (600, output_dim)

    ref_t_matched = _reference_forward_matched(x_big, params, num_layers)
    assert jnp.allclose(out_t, ref_t_matched, atol=3e-2, rtol=3e-2), \
        "tiled path mismatch vs matched (bf16-matmul) reference"
    ref_t_f32 = _reference_forward_f32(x_big, params, num_layers)
    assert jnp.allclose(out_t, ref_t_f32, atol=1e-1, rtol=5e-2), \
        "tiled path mismatch vs f32 reference"

    print("KERNEL_OK")
</pallas_src>

<mosaic_0001>
module attributes {stable_mosaic.version = 11 : i64} {
  func.func @kernel(%arg0: memref<16x128xbf16, #tpu.memory_space<vmem>>, %arg1: memref<128x128xbf16, #tpu.memory_space<vmem>>, %arg2: memref<128x128xbf16, #tpu.memory_space<vmem>>, %arg3: memref<2x2x128xf32, #tpu.memory_space<vmem>>, %arg4: memref<128x128xbf16, #tpu.memory_space<vmem>>, %arg5: memref<1x128xf32, #tpu.memory_space<vmem>>, %arg6: memref<16x128xf32, #tpu.memory_space<vmem>>) attributes {dimension_semantics = [], scalar_prefetch = 0 : i64, scratch_operands = 0 : i64, tpu.core_type = #tpu.core_type<tc>} {
    %c0 = arith.constant 0 : index
    %c0_0 = arith.constant 0 : index
    %0 = vector.load %arg0[%c0, %c0_0] : memref<16x128xbf16, #tpu.memory_space<vmem>>, vector<16x128xbf16>
    %c0_1 = arith.constant 0 : index
    %c0_2 = arith.constant 0 : index
    %c0_3 = arith.constant 0 : index
    %1 = vector.load %arg3[%c0_1, %c0_2, %c0_3] : memref<2x2x128xf32, #tpu.memory_space<vmem>>, vector<2x2x128xf32>
    %2 = tpu.iota {dimensions = array<i32: 0>} : vector<16x1xi32>
    %c8_i32 = arith.constant 8 : i32
    %3 = vector.broadcast %c8_i32 : i32 to vector<16x1xi32>
    %4 = arith.cmpi slt, %2, %3 : vector<16x1xi32>
    %5 = vector.extract_strided_slice %1 {offsets = [0, 0, 0], sizes = [1, 1, 128], strides = [1, 1, 1]} : vector<2x2x128xf32> to vector<1x1x128xf32>
    %6 = vector.shape_cast %5 : vector<1x1x128xf32> to vector<1x128xf32>
    %7 = vector.extract_strided_slice %1 {offsets = [0, 1, 0], sizes = [1, 1, 128], strides = [1, 1, 1]} : vector<2x2x128xf32> to vector<1x1x128xf32>
    %8 = vector.shape_cast %7 : vector<1x1x128xf32> to vector<1x128xf32>
    %c0_4 = arith.constant 0 : index
    %c0_5 = arith.constant 0 : index
    %9 = vector.load %arg1[%c0_4, %c0_5] : memref<128x128xbf16, #tpu.memory_space<vmem>>, vector<128x128xbf16>
    %cst = arith.constant dense<0.000000e+00> : vector<16x128xf32>
    %10 = tpu.matmul %0, %9, %cst {dimension_numbers = #tpu.dot_dimension_numbers<[1], [0], [0], [1], [0, 0, 1, 1], [], []>} : vector<16x128xbf16>, vector<128x128xbf16>, vector<16x128xf32> -> vector<16x128xf32>
    %cst_6 = arith.constant dense<0.000000e+00> : vector<128xf32>
    %11 = vector.multi_reduction <add>, %10, %cst_6 [0] : vector<16x128xf32> to vector<128xf32>
    %12 = vector.shape_cast %11 : vector<128xf32> to vector<1x128xf32>
    %cst_7 = arith.constant 1.250000e-01 : f32
    %13 = vector.broadcast %cst_7 : f32 to vector<1x128xf32>
    %14 = arith.mulf %12, %13 : vector<1x128xf32>
    %15 = vector.broadcast %14 : vector<1x128xf32> to vector<16x128xf32>
    %16 = arith.subf %10, %15 : vector<16x128xf32>
    %cst_8 = arith.constant 0.000000e+00 : f32
    %17 = vector.shape_cast %4 : vector<16x1xi1> to vector<16x1xi1>
    %18 = vector.broadcast %17 : vector<16x1xi1> to vector<16x128xi1>
    %19 = vector.broadcast %cst_8 : f32 to vector<16x128xf32>
    %20 = arith.select %18, %16, %19 : vector<16x128xi1>, vector<16x128xf32>
    %21 = arith.mulf %20, %16 : vector<16x128xf32>
    %cst_9 = arith.constant dense<0.000000e+00> : vector<128xf32>
    %22 = vector.multi_reduction <add>, %21, %cst_9 [0] : vector<16x128xf32> to vector<128xf32>
    %23 = vector.shape_cast %22 : vector<128xf32> to vector<1x128xf32>
    %cst_10 = arith.constant 1.250000e-01 : f32
    %24 = vector.broadcast %cst_10 : f32 to vector<1x128xf32>
    %25 = arith.mulf %23, %24 : vector<1x128xf32>
    %cst_11 = arith.constant 0.000000e+00 : f32
    %26 = vector.broadcast %cst_11 : f32 to vector<1x128xf32>
    %27 = arith.maximumf %25, %26 : vector<1x128xf32>
    %cst_12 = arith.constant 9.99999974E-6 : f32
    %28 = vector.broadcast %cst_12 : f32 to vector<1x128xf32>
    %29 = arith.addf %27, %28 : vector<1x128xf32>
    %30 = math.rsqrt %29 : vector<1x128xf32>
    %31 = arith.mulf %30, %6 : vector<1x128xf32>
    %32 = arith.mulf %14, %31 : vector<1x128xf32>
    %33 = arith.subf %8, %32 : vector<1x128xf32>
    %34 = vector.broadcast %31 : vector<1x128xf32> to vector<16x128xf32>
    %35 = arith.mulf %10, %34 : vector<16x128xf32>
    %36 = vector.broadcast %33 : vector<1x128xf32> to vector<16x128xf32>
    %37 = arith.addf %35, %36 : vector<16x128xf32>
    %cst_13 = arith.constant 0.000000e+00 : f32
    %38 = vector.broadcast %cst_13 : f32 to vector<16x128xf32>
    %39 = arith.maximumf %37, %38 : vector<16x128xf32>
    %cst_14 = arith.constant 0.000000e+00 : f32
    %40 = vector.shape_cast %4 : vector<16x1xi1> to vector<16x1xi1>
    %41 = vector.broadcast %40 : vector<16x1xi1> to vector<16x128xi1>
    %42 = vector.broadcast %cst_14 : f32 to vector<16x128xf32>
    %43 = arith.select %41, %39, %42 : vector<16x128xi1>, vector<16x128xf32>
    %44 = arith.truncf %43 : vector<16x128xf32> to vector<16x128xbf16>
    %45 = vector.extract_strided_slice %1 {offsets = [1, 0, 0], sizes = [1, 1, 128], strides = [1, 1, 1]} : vector<2x2x128xf32> to vector<1x1x128xf32>
    %46 = vector.shape_cast %45 : vector<1x1x128xf32> to vector<1x128xf32>
    %47 = vector.extract_strided_slice %1 {offsets = [1, 1, 0], sizes = [1, 1, 128], strides = [1, 1, 1]} : vector<2x2x128xf32> to vector<1x1x128xf32>
    %48 = vector.shape_cast %47 : vector<1x1x128xf32> to vector<1x128xf32>
    %c0_15 = arith.constant 0 : index
    %c0_16 = arith.constant 0 : index
    %49 = vector.load %arg2[%c0_15, %c0_16] : memref<128x128xbf16, #tpu.memory_space<vmem>>, vector<128x128xbf16>
    %cst_17 = arith.constant dense<0.000000e+00> : vector<16x128xf32>
    %50 = tpu.matmul %44, %49, %cst_17 {dimension_numbers = #tpu.dot_dimension_numbers<[1], [0], [0], [1], [0, 0, 1, 1], [], []>} : vector<16x128xbf16>, vector<128x128xbf16>, vector<16x128xf32> -> vector<16x128xf32>
    %cst_18 = arith.constant dense<0.000000e+00> : vector<128xf32>
    %51 = vector.multi_reduction <add>, %50, %cst_18 [0] : vector<16x128xf32> to vector<128xf32>
    %52 = vector.shape_cast %51 : vector<128xf32> to vector<1x128xf32>
    %cst_19 = arith.constant 1.250000e-01 : f32
    %53 = vector.broadcast %cst_19 : f32 to vector<1x128xf32>
    %54 = arith.mulf %52, %53 : vector<1x128xf32>
    %55 = vector.broadcast %54 : vector<1x128xf32> to vector<16x128xf32>
    %56 = arith.subf %50, %55 : vector<16x128xf32>
    %cst_20 = arith.constant 0.000000e+00 : f32
    %57 = vector.shape_cast %4 : vector<16x1xi1> to vector<16x1xi1>
    %58 = vector.broadcast %57 : vector<16x1xi1> to vector<16x128xi1>
    %59 = vector.broadcast %cst_20 : f32 to vector<16x128xf32>
    %60 = arith.select %58, %56, %59 : vector<16x128xi1>, vector<16x128xf32>
    %61 = arith.mulf %60, %56 : vector<16x128xf32>
    %cst_21 = arith.constant dense<0.000000e+00> : vector<128xf32>
    %62 = vector.multi_reduction <add>, %61, %cst_21 [0] : vector<16x128xf32> to vector<128xf32>
    %63 = vector.shape_cast %62 : vector<128xf32> to vector<1x128xf32>
    %cst_22 = arith.constant 1.250000e-01 : f32
    %64 = vector.broadcast %cst_22 : f32 to vector<1x128xf32>
    %65 = arith.mulf %63, %64 : vector<1x128xf32>
    %cst_23 = arith.constant 0.000000e+00 : f32
    %66 = vector.broadcast %cst_23 : f32 to vector<1x128xf32>
    %67 = arith.maximumf %65, %66 : vector<1x128xf32>
    %cst_24 = arith.constant 9.99999974E-6 : f32
    %68 = vector.broadcast %cst_24 : f32 to vector<1x128xf32>
    %69 = arith.addf %67, %68 : vector<1x128xf32>
    %70 = math.rsqrt %69 : vector<1x128xf32>
    %71 = arith.mulf %70, %46 : vector<1x128xf32>
    %72 = arith.mulf %54, %71 : vector<1x128xf32>
    %73 = arith.subf %48, %72 : vector<1x128xf32>
    %74 = vector.broadcast %71 : vector<1x128xf32> to vector<16x128xf32>
    %75 = arith.mulf %50, %74 : vector<16x128xf32>
    %76 = vector.broadcast %73 : vector<1x128xf32> to vector<16x128xf32>
    %77 = arith.addf %75, %76 : vector<16x128xf32>
    %cst_25 = arith.constant 0.000000e+00 : f32
    %78 = vector.broadcast %cst_25 : f32 to vector<16x128xf32>
    %79 = arith.maximumf %77, %78 : vector<16x128xf32>
    %cst_26 = arith.constant 0.000000e+00 : f32
    %80 = vector.shape_cast %4 : vector<16x1xi1> to vector<16x1xi1>
    %81 = vector.broadcast %80 : vector<16x1xi1> to vector<16x128xi1>
    %82 = vector.broadcast %cst_26 : f32 to vector<16x128xf32>
    %83 = arith.select %81, %79, %82 : vector<16x128xi1>, vector<16x128xf32>
    %84 = arith.truncf %83 : vector<16x128xf32> to vector<16x128xbf16>
    %c0_27 = arith.constant 0 : index
    %c0_28 = arith.constant 0 : index
    %85 = vector.load %arg4[%c0_27, %c0_28] : memref<128x128xbf16, #tpu.memory_space<vmem>>, vector<128x128xbf16>
    %cst_29 = arith.constant dense<0.000000e+00> : vector<16x128xf32>
    %86 = tpu.matmul %84, %85, %cst_29 {dimension_numbers = #tpu.dot_dimension_numbers<[1], [0], [0], [1], [0, 0, 1, 1], [], []>} : vector<16x128xbf16>, vector<128x128xbf16>, vector<16x128xf32> -> vector<16x128xf32>
    %c0_30 = arith.constant 0 : index
    %c0_31 = arith.constant 0 : index
    %87 = vector.load %arg5[%c0_30, %c0_31] : memref<1x128xf32, #tpu.memory_space<vmem>>, vector<1x128xf32>
    %88 = vector.broadcast %87 : vector<1x128xf32> to vector<16x128xf32>
    %89 = arith.addf %86, %88 : vector<16x128xf32>
    %c0_32 = arith.constant 0 : index
    %c0_33 = arith.constant 0 : index
    %90 = vector.load %arg6[%c0_32, %c0_33] : memref<16x128xf32, #tpu.memory_space<vmem>>, vector<16x128xf32>
    tpu.vector_store %arg6[%c0_32, %c0_33], %89 {strides = array<i32>} : memref<16x128xf32, #tpu.memory_space<vmem>>, vector<16x128xf32>,
    return
  }
}

</mosaic_0001>

<bundles_post_ra>
// kernel: mlp_forward.1
= control target key start
LH: loop header
LB: loop body
LE: loop exit
PB: predicated region body
PF: predicated region fallthrough
CT: control target
= control target key end

     0   :  { %11 = vsyncpa [#allocation3], 0  ;;  %s885_s0 = inlined_call_operand.vmem [shape: bf16[16,128], index: 0, kind: input, shape index: {}]   ;;  %s886_s1 = inlined_call_operand.hbm [shape: bf16[128,128], index: 1, kind: input, shape index: {}]   ;;  %s887_s2 = inlined_call_operand.hbm [shape: bf16[128,128], index: 2, kind: input, shape index: {}]   ;;  %s888_s3 = inlined_call_operand.vmem [shape: f32[2,2,128], index: 3, kind: input, shape index: {}]   ;;  %s889_s4 = inlined_call_operand.hbm [shape: bf16[128,128], index: 4, kind: input, shape index: {}]   ;;  %s890_s5 = inlined_call_operand.vmem [shape: f32[1,128], index: 5, kind: input, shape index: {}]   ;;  %s891_s6 = inlined_call_operand.vmem [shape: f32[16,128], index: 6, kind: output, shape index: {}]  }
   0x1   :  { %12 = vsyncpa [#allocation5], 0  ;;  %s729_s21 = smov [#allocation4]   ;;  %s730_s23 = smov [#allocation2]  }
   0x2   :  { %s32_s22 = sshll.u32 %s729_s21, 4  ;;  %s20_s24 = sshll.u32 %s730_s23, 4  ;;  %s33_s22 = int_to_ptr.vmem [resolvable:$true] %s32_s22  ;;  %s771_s24 = int_to_ptr.vmem [resolvable:$true] %s20_s24 }
   0x3   :  { %s659_s27 = scalar_lea.hbm %s887_s2, 1024 }
   0x4   :  { %p660_p0 = scmp.ne.s32.totalorder %s887_s2, %s659_s27  ;;  %p663_p1 = scmp.lt.u32.totalorder %s659_s27, %s887_s2 }
   0x6   :  { %p665_p2 = pnand %p663_p1, %p660_p0 }
   0x8   :  { %668 = shalt.err (!%p665_p2)
}
   0x9   :  { %s669_s8 = scalar_lea.vmem %s33_s22, 1024  ;;  %p674_p4 = scmp.lt.s32.totalorder %s33_s22, %s33_s22 }
   0xa   :  { %p670_p3 = scmp.ne.s32.totalorder %s33_s22, %s669_s8  ;;  %p675_p5 = scmp.lt.s32.totalorder %s669_s8, %s669_s8 }
   0xc   :  { %p676_p6 = por %p675_p5, %p674_p4 }
   0xe   :  { %p677_p7 = pnand %p676_p6, %p670_p3 }
  0x10   :  { %680 = shalt.err (!%p677_p7)
}
  0x11   :  { %s731_s9 = smov 64   ;;  %s732_s10 = smov 4  }
  0x12   :  { %38 = dma.hbm_to_vmem [thread:$0]  %s887_s2, 1024, %s33_s22, [#allocation5], %s731_s9, %s731_s9, %s732_s10  }
  0x13   :  { %s681_s15 = scalar_lea.hbm %s886_s1, 1024 }
  0x14   :  { %p682_p8 = scmp.ne.s32.totalorder %s886_s1, %s681_s15  ;;  %p685_p9 = scmp.lt.u32.totalorder %s681_s15, %s886_s1 }
  0x16   :  { %p687_p10 = pnand %p685_p9, %p682_p8 }
  0x18   :  { %690 = shalt.err (!%p687_p10)
}
  0x19   :  { %s691_s20 = scalar_lea.vmem %s771_s24, 1024  ;;  %p696_p12 = scmp.lt.s32.totalorder %s771_s24, %s771_s24 }
  0x1a   :  { %p692_p11 = scmp.ne.s32.totalorder %s771_s24, %s691_s20  ;;  %p697_p13 = scmp.lt.s32.totalorder %s691_s20, %s691_s20 }
  0x1c   :  { %p698_p0 = por %p697_p13, %p696_p12 }
  0x1e   :  { %p699_p1 = pnand %p698_p0, %p692_p11 }
  0x20   :  { %702 = shalt.err (!%p699_p1)
}
  0x21   :  { %26 = dma.hbm_to_vmem [thread:$0]  %s886_s1, 1024, %s771_s24, [#allocation3], %s731_s9, %s731_s9, %s732_s10  }
  0x22   :  { %s733_s22 = smov [#allocation6]   ;;  %s703_s27 = scalar_lea.hbm %s889_s4, 1024 }
  0x23   :  { %s46_s23 = sshll.u32 %s733_s22, 4  ;;  %p704_p2 = scmp.ne.s32.totalorder %s889_s4, %s703_s27  ;;  %s47_s23 = int_to_ptr.vmem [resolvable:$true] %s46_s23 }
  0x24   :  { %p707_p3 = scmp.lt.u32.totalorder %s703_s27, %s889_s4 }
  0x26   :  { %p709_p4 = pnand %p707_p3, %p704_p2 }
  0x28   :  { %712 = shalt.err (!%p709_p4)
}
  0x29   :  { %s713_s8 = scalar_lea.vmem %s47_s23, 1024  ;;  %p718_p6 = scmp.lt.s32.totalorder %s47_s23, %s47_s23 }
  0x2a   :  { %p714_p5 = scmp.ne.s32.totalorder %s47_s23, %s713_s8  ;;  %p719_p7 = scmp.lt.s32.totalorder %s713_s8, %s713_s8 }
  0x2c   :  { %p720_p8 = por %p719_p7, %p718_p6 }
  0x2e   :  { %p721_p9 = pnand %p720_p8, %p714_p5 }
  0x30   :  { %724 = shalt.err (!%p721_p9)
}
  0x31   :  { %52 = dma.hbm_to_vmem [thread:$0]  %s889_s4, 1024, %s47_s23, [#allocation5], %s731_s9, %s731_s9, %s732_s10  }
  0x32   :  { %725 = dma.done.wait [#allocation3], 1024  }
  0x33   :  { %726 = vsyncadd [#allocation3], 4294966272 }
  0x34   :  { %727 = dma.done.wait [#allocation5], 2048  }
  0x35   :  { %728 = vsyncadd [#allocation5], 4294965248  ;;  %v734_v0 = vmov 0.0   ;;  %vm735_vm0 = vmmov 0   ;;  %v630_v1 = vld [vmem:[#allocation2] sm:$0xff]   ;;  %v631_v2 = vld [vmem:[#allocation2 + $0x8] sm:$0xff]   ;;  %v220_v44 = vlaneseq }
  0x36   :  { %563 = vmatprep.subr.bf16.mxu0 %v734_v0  ;;  %579 = vmatprep.mubr.msk.bf16.mxu0 %vm735_vm0, %v734_v0  ;;  %v632_v3 = vld [vmem:[#allocation2 + $0x10] sm:$0xff]   ;;  %v633_v4 = vld [vmem:[#allocation2 + $0x18] sm:$0xff]   ;;  %v634_v5 = vld [vmem:[#allocation2 + $0x20] sm:$0xff]  }
  0x37   :  { %583 = vmatprep.subr.bf16.mxu1 %v734_v0  ;;  %599 = vmatprep.mubr.msk.bf16.mxu1 %vm735_vm0, %v734_v0  ;;  %v635_v6 = vld [vmem:[#allocation2 + $0x28] sm:$0xff]   ;;  %v636_v7 = vld [vmem:[#allocation2 + $0x30] sm:$0xff]   ;;  %v637_v8 = vld [vmem:[#allocation2 + $0x38] sm:$0xff]   ;;  %v849_v45 = vshrl.u32 %v220_v44, 7 }
  0x38   :  { %564 = vmatpush3.bf16.msra.mxu0 %v630_v1  ;;  %v638_v9 = vld [vmem:[%s885_s0] sm:$0xff]   ;;  %v640_v11 = vld [vmem:[#allocation4 + $0x8] sm:$0xff]   ;;  %v641_v12 = vld [vmem:[#allocation4 + $0x10] sm:$0xff]  }
  0x39   :  { %565 = vmatprep.subr.bf16.mxu0 %v734_v0  ;;  %v639_v10 = vld [vmem:[#allocation4] sm:$0xff]   ;;  %v642_v13 = vld [vmem:[#allocation4 + $0x18] sm:$0xff]   ;;  %v644_v15 = vld [vmem:[#allocation4 + $0x28] sm:$0xff]   ;;  %v222_v47 = vsub.s32 0, %v849_v45  ;;  %v228_v54 = vsub.s32 1, %v849_v45 }
  0x3a   :  { %584 = vmatpush3.bf16.msra.mxu1 %v639_v10  ;;  %v643_v14 = vld [vmem:[#allocation4 + $0x20] sm:$0xff]   ;;  %v645_v16 = vld [vmem:[#allocation4 + $0x30] sm:$0xff]   ;;  %v646_v17 = vld [vmem:[#allocation4 + $0x38] sm:$0xff]  }
  0x3b   :  { %585 = vmatprep.subr.bf16.mxu1 %v734_v0  ;;  %v67_v46 = vld [vmem:[%s888_s3] sm:$0x3]  ;;  %v648_v61 = vld [vmem:[#allocation6 + $0x8] sm:$0xff]   ;;  %v649_v62 = vld [vmem:[#allocation6 + $0x10] sm:$0xff]  }
  0x3c   :  { %566 = vmatpush3.bf16.msra.mxu0 %v631_v2  ;;  %v647_v60 = vld [vmem:[#allocation6] sm:$0xff]   ;;  %v650_v63 = vld [vmem:[#allocation6 + $0x18] sm:$0xff]   ;;  %v652_v2 = vld [vmem:[#allocation6 + $0x28] sm:$0xff]  }
  0x3d   :  { %567 = vmatprep.subr.bf16.mxu0 %v734_v0  ;;  %v651_v1 = vld [vmem:[#allocation6 + $0x20] sm:$0xff]  }
  0x3e   :  { %586 = vmatpush3.bf16.msra.mxu1 %v640_v11 }
  0x3f   :  { %587 = vmatprep.subr.bf16.mxu1 %v734_v0 }
  0x40   :  { %568 = vmatpush3.bf16.msra.mxu0 %v632_v3  ;;  %v653_v3 = vld [vmem:[#allocation6 + $0x30] sm:$0xff]  }
  0x41   :  { %569 = vmatprep.subr.bf16.mxu0 %v734_v0 }
  0x42   :  { %588 = vmatpush3.bf16.msra.mxu1 %v641_v12 }
  0x43   :  { %589 = vmatprep.subr.bf16.mxu1 %v734_v0 }
  0x44   :  { %570 = vmatpush3.bf16.msra.mxu0 %v633_v4  ;;  %v654_v4 = vld [vmem:[#allocation6 + $0x38] sm:$0xff]  }
  0x45   :  { %571 = vmatprep.subr.bf16.mxu0 %v734_v0 }
  0x46   :  { %590 = vmatpush3.bf16.msra.mxu1 %v642_v13 }
  0x47   :  { %591 = vmatprep.subr.bf16.mxu1 %v734_v0 }
  0x48   :  { %572 = vmatpush3.bf16.msra.mxu0 %v634_v5 }
  0x49   :  { %573 = vmatprep.subr.bf16.mxu0 %v734_v0 }
  0x4a   :  { %592 = vmatpush3.bf16.msra.mxu1 %v643_v14 }
  0x4b   :  { %593 = vmatprep.subr.bf16.mxu1 %v734_v0 }
  0x4c   :  { %574 = vmatpush3.bf16.msra.mxu0 %v635_v6 }
  0x4d   :  { %575 = vmatprep.subr.bf16.mxu0 %v734_v0 }
  0x4e   :  { %594 = vmatpush3.bf16.msra.mxu1 %v644_v15 }
  0x4f   :  { %595 = vmatprep.subr.bf16.mxu1 %v734_v0 }
  0x50   :  { %576 = vmatpush3.bf16.msra.mxu0 %v636_v7 }
  0x51   :  { %577 = vmatprep.subr.bf16.mxu0 %v734_v0 }
  0x52   :  { %596 = vmatpush3.bf16.msra.mxu1 %v645_v16 }
  0x53   :  { %597 = vmatprep.subr.bf16.mxu1 %v734_v0 }
  0x54   :  { %578 = vmatpush3.bf16.msra.mxu0 %v637_v8 }
  0x55   :  { %603 = vmatprep.subr.bf16.mxu0 %v734_v0 }
  0x56   :  { %598 = vmatpush3.bf16.msra.mxu1 %v646_v17 }
  0x57   :  { %580 = vmatmul.mubr.bf16.vlgmr.msra.gmra.mrb[0].mxu0 %v638_v9 }
  0x58   :  { %619 = vmatprep.mubr.msk.bf16.mxu0 %vm735_vm0, %v734_v0  ;;  %604 = vmatpush3.bf16.msra.mxu0 %v647_v60 }
  0x59   :  { %605 = vmatprep.subr.bf16.mxu0 %v734_v0 }
  0x5c   :  { %606 = vmatpush3.bf16.msra.mxu0 %v648_v61 }
  0x5d   :  { %607 = vmatprep.subr.bf16.mxu0 %v734_v0 }
  0x60   :  { %608 = vmatpush3.bf16.msra.mxu0 %v649_v62 }
  0x61   :  { %609 = vmatprep.subr.bf16.mxu0 %v734_v0 }
  0x64   :  { %610 = vmatpush3.bf16.msra.mxu0 %v650_v63 }
  0x65   :  { %611 = vmatprep.subr.bf16.mxu0 %v734_v0 }
  0x68   :  { %612 = vmatpush3.bf16.msra.mxu0 %v651_v1 }
  0x69   :  { %613 = vmatprep.subr.bf16.mxu0 %v734_v0 }
  0x6c   :  { %614 = vmatpush3.bf16.msra.mxu0 %v652_v2 }
  0x6d   :  { %615 = vmatprep.subr.bf16.mxu0 %v734_v0 }
  0x70   :  { %616 = vmatpush3.bf16.msra.mxu0 %v653_v3 }
  0x71   :  { %617 = vmatprep.subr.bf16.mxu0 %v734_v0 }
  0x74   :  { %618 = vmatpush3.bf16.msra.mxu0 %v654_v4 }
 0x12a   :  { %v178_v18 = vpop.f32.mrb[0].mxu0 }
 0x12b   :  { %v581_v19 = vpop.f32.mrb[1].mxu0 }
 0x12c   :  { %v181_v20 = vpop.f32.mrb[2].mxu0 }
 0x12d   :  { %v185_v21 = vadd.f32 %v181_v20, %v178_v18  ;;  %v582_v22 = vpop.f32.mrb[3].mxu0 }
 0x12f   :  { %v186_v23 = vrot.slane %v185_v21, 4 }
 0x131   :  { %v187_v24 = vadd.f32 %v186_v23, %v185_v21 }
 0x133   :  { %v188_v25 = vrot.slane %v187_v24, 2 }
 0x135   :  { %v189_v26 = vadd.f32 %v188_v25, %v187_v24 }
 0x137   :  { %v190_v27 = vrot.slane %v189_v26, 1 }
 0x139   :  { %v191_v28 = vadd.f32 %v190_v27, %v189_v26 }
 0x13b   :  { %v192_v29 = vmul.f32 0.125, %v191_v28 }
 0x13d   :  { %v193_v30 = vsub.f32 %v178_v18, %v192_v29  ;;  %v194_v31 = vsub.f32 %v181_v20, %v192_v29 }
 0x13f   :  { %v201_v32 = vmul.f32 %v193_v30, %v193_v30  ;;  %v202_v33 = vmul.f32 0.0, %v194_v31  ;;  %v68_v31 = vld [vmem:[%s888_s3 + $0x2] sm:$0x3] }
 0x141   :  { %v203_v34 = vadd.f32 %v202_v33, %v201_v32 }
 0x143   :  { %v204_v35 = vrot.slane %v203_v34, 4 }
 0x145   :  { %v205_v36 = vadd.f32 %v204_v35, %v203_v34 }
 0x147   :  { %v206_v37 = vrot.slane %v205_v36, 2 }
 0x149   :  { %v207_v38 = vadd.f32 %v206_v37, %v205_v36 }
 0x14b   :  { %v208_v39 = vrot.slane %v207_v38, 1 }
 0x14d   :  { %v209_v40 = vadd.f32 %v208_v39, %v207_v38 }
 0x14f   :  { %v210_v41 = vmul.f32 0.125, %v209_v40 }
 0x151   :  { %v211_v42 = vmax.f32 %v210_v41, 0.0 }
 0x153   :  { %v212_v43 = vadd.f32 1e-05, %v211_v42 }
 0x155   :  { %655 = vrsqrt.f32 %v212_v43  ;;  %v527_v43 = vld [vmem:[%s890_s5] ss:$0 sm:$0xff] }
 0x15f   :  { %v656_v48 = vpop.eup %655 }
 0x160   :  { %v214_v49 = vmul.f32 %v656_v48, %v67_v46 }
 0x162   :  { %v215_v50 = vmul.f32 %v214_v49, %v192_v29  ;;  %v223_v51 = vrot.slane %v214_v49, %v222_v47 }
 0x164   :  { %v217_v52 = vrot.slane %v215_v50, 7  ;;  %v224_v53 = vmul.f32 %v223_v51, %v178_v18 }
 0x166   :  { %v219_v55 = vsub.f32 %v67_v46, %v217_v52 }
 0x168   :  { %v229_v56 = vrot.slane %v219_v55, %v228_v54 }
 0x16a   :  { %v230_v57 = vadd.f32 %v229_v56, %v224_v53 }
 0x16c   :  { %v232_v58 = vmax.f32 %v230_v57, 0.0 }
 0x16e   :  { %v236_v59 = vpack.c.bf16 %v734_v0, %v232_v58 }
 0x170   :  { %600 = vmatmul.mubr.bf16.vlgmr.msra.gmra.mrb[0].mxu1 %v236_v59 }
 0x243   :  { %v335_v5 = vpop.f32.mrb[0].mxu1 }
 0x244   :  { %v601_v6 = vpop.f32.mrb[1].mxu1 }
 0x245   :  { %v338_v7 = vpop.f32.mrb[2].mxu1 }
 0x246   :  { %v342_v8 = vadd.f32 %v338_v7, %v335_v5  ;;  %v602_v9 = vpop.f32.mrb[3].mxu1 }
 0x248   :  { %v343_v10 = vrot.slane %v342_v8, 4 }
 0x24a   :  { %v344_v11 = vadd.f32 %v343_v10, %v342_v8 }
 0x24c   :  { %v345_v12 = vrot.slane %v344_v11, 2 }
 0x24e   :  { %v346_v13 = vadd.f32 %v345_v12, %v344_v11 }
 0x250   :  { %v347_v14 = vrot.slane %v346_v13, 1 }
 0x252   :  { %v348_v15 = vadd.f32 %v347_v14, %v346_v13 }
 0x254   :  { %v349_v16 = vmul.f32 0.125, %v348_v15 }
 0x256   :  { %v350_v17 = vsub.f32 %v335_v5, %v349_v16  ;;  %v351_v18 = vsub.f32 %v338_v7, %v349_v16 }
 0x258   :  { %v354_v19 = vmul.f32 %v350_v17, %v350_v17  ;;  %v355_v20 = vmul.f32 0.0, %v351_v18 }
 0x25a   :  { %v356_v21 = vadd.f32 %v355_v20, %v354_v19 }
 0x25c   :  { %v357_v22 = vrot.slane %v356_v21, 4 }
 0x25e   :  { %v358_v23 = vadd.f32 %v357_v22, %v356_v21 }
 0x260   :  { %v359_v24 = vrot.slane %v358_v23, 2 }
 0x262   :  { %v360_v25 = vadd.f32 %v359_v24, %v358_v23 }
 0x264   :  { %v361_v26 = vrot.slane %v360_v25, 1 }
 0x266   :  { %v362_v27 = vadd.f32 %v361_v26, %v360_v25 }
 0x268   :  { %v363_v28 = vmul.f32 0.125, %v362_v27 }
 0x26a   :  { %v364_v29 = vmax.f32 %v363_v28, 0.0 }
 0x26c   :  { %v365_v30 = vadd.f32 1e-05, %v364_v29 }
 0x26e   :  { %657 = vrsqrt.f32 %v365_v30 }
 0x278   :  { %v658_v32 = vpop.eup %657 }
 0x279   :  { %v367_v33 = vmul.f32 %v658_v32, %v68_v31 }
 0x27b   :  { %v368_v34 = vmul.f32 %v367_v33, %v349_v16  ;;  %v376_v35 = vrot.slane %v367_v33, %v222_v47 }
 0x27d   :  { %v370_v36 = vrot.slane %v368_v34, 7  ;;  %v377_v37 = vmul.f32 %v376_v35, %v335_v5 }
 0x27f   :  { %v372_v38 = vsub.f32 %v68_v31, %v370_v36 }
 0x281   :  { %v382_v39 = vrot.slane %v372_v38, %v228_v54 }
 0x283   :  { %v383_v40 = vadd.f32 %v382_v39, %v377_v37 }
 0x285   :  { %v385_v41 = vmax.f32 %v383_v40, 0.0 }
 0x287   :  { %v389_v42 = vpack.c.bf16 %v734_v0, %v385_v41 }
 0x289   :  { %620 = vmatmul.mubr.bf16.vlgmr.msra.gmra.mrb[4].mxu0 %v389_v42 }
 0x35c   :  { %v495_v44 = vpop.f32.mrb[4].mxu0 }
 0x35d   :  { %v496_v46 = vadd.f32 %v527_v43, %v495_v44  ;;  %v621_v48 = vpop.f32.mrb[5].mxu0 }
 0x35e   :  { %v498_v49 = vpop.f32.mrb[6].mxu0 }
 0x35f   :  { %502 = vst [vmem:[%s891_s6] sm:$0xff] %v496_v46  ;;  %v499_v47 = vadd.f32 %v527_v43, %v498_v49  ;;  %v622_v45 = vpop.f32.mrb[7].mxu0 }
 0x361   :  { %503 = vst [vmem:[%s891_s6 + $0x8] sm:$0xff] %v499_v47 }
 0x362   :  { %508 = vsyncpa [#allocation3], 1 }
 0x363   :  { %509 = vsyncpa [#allocation5], 1 }

</bundles_post_ra>
